<compile_context>
chip_gen: v7x
topology: tpu7x:2x2x1
jax: 0.10.0
libtpu: 0.0.40
codegen_flags: <defaults>
</compile_context>

<pallas_src>
import jax
import jax.numpy as jnp
from jax.experimental import pallas as pl
from jax.experimental.pallas import tpu as pltpu

_EPS = 1e-5  # PyTorch BatchNorm1d default eps


def _bn(x, gamma, beta):
    # torch.nn.BatchNorm1d in training mode: biased batch statistics over axis 0.
    # Single pass: sum and sum-of-squares (halves the cross-sublane reductions).
    n = x.shape[0]
    inv_n = 1.0 / float(n)
    s = jnp.sum(x, axis=0, keepdims=True)
    ss = jnp.sum(x * x, axis=0, keepdims=True)
    mean = s * inv_n
    var = jnp.maximum(ss * inv_n - mean * mean, 0.0)
    return gamma * (x - mean) * jax.lax.rsqrt(var + _EPS) + beta


def _softplus(x):
    # torch.nn.Softplus(beta=1, threshold=20)
    return jnp.where(x > 20.0, x, jnp.log1p(jnp.exp(jnp.minimum(x, 20.0))))


def _cgcnn_kernel(node_ref, edge_ref, src_oh_ref, dst_oh_ref,
                  w1s_ref, w1d_ref, w1e_ref, small_ref, out_ref):
    node = node_ref[...]            # [N, F]   (F = lane-padded node feature dim)
    edge = edge_ref[...]            # [E, Fe_p]

    # Packed per-feature params: rows = b1, g1, bt1, g2, bt2, g3, bt3.
    small = small_ref[...]
    b1, g1, bt1 = small[0:1, :], small[1:2, :], small[2:3, :]
    g2, bt2 = small[3:4, :], small[4:5, :]
    g3, bt3 = small[5:6, :], small[6:7, :]

    # Reassociated fc_full1: project at node granularity (O(N*F^2)), then
    # gather with the one-hots -- (OH @ node) @ W == OH @ (node @ W).
    src_proj = jnp.dot(node, w1s_ref[...], preferred_element_type=jnp.float32)   # [N, F]
    dst_proj = jnp.dot(node, w1d_ref[...], preferred_element_type=jnp.float32)   # [N, F]
    edge_proj = jnp.dot(edge, w1e_ref[...], preferred_element_type=jnp.float32)  # [E, F]

    # edges.src['node'] / edges.dst['node'] gathers as one-hot matmuls (MXU).
    src_e = jnp.dot(src_oh_ref[...], src_proj, preferred_element_type=jnp.float32)  # [E, F]
    dst_e = jnp.dot(dst_oh_ref[...], dst_proj, preferred_element_type=jnp.float32)  # [E, F]

    z1 = src_e + dst_e + edge_proj + b1
    nbr_filter = jax.nn.sigmoid(_bn(z1, g1, bt1))

    # NOTE: in the reference, fc_full2's output is immediately overwritten
    # (bn2 is applied to nbr_filter, not nbr_core), so fc_full2 is dead code
    # and is not computed here at all.
    nbr_core = _softplus(_bn(nbr_filter, g2, bt2))
    nbr_ewm = nbr_filter * nbr_core                 # per-edge messages 'h' [E, F]

    # update_all(copy_e('h'), sum): scatter-add onto destination nodes, reusing
    # dst_oh (contract over the edge axis) instead of a materialized transpose.
    new_node = jax.lax.dot_general(
        dst_oh_ref[...], nbr_ewm,
        dimension_numbers=(((0,), (0,)), ((), ())),
        preferred_element_type=jnp.float32)         # [N, F]

    out_ref[...] = node + _bn(new_node, g3, bt3)    # node_feats += bn3(new_node)


def cgcnn_conv(node_feats, edge_feats, src_idx, dst_idx, params, *, lane=128):
    """Returns (updated node_feats, unchanged edge_feats)."""
    N, Fn = node_feats.shape
    E, Fe = edge_feats.shape

    # Pad feature axes to lane-dense width (full 128-lane vregs, unmasked vst).
    Fp = ((Fn + lane - 1) // lane) * lane
    Fep = ((Fe + lane - 1) // lane) * lane

    node_p = jnp.pad(node_feats.astype(jnp.float32), ((0, 0), (0, Fp - Fn)))
    edge_p = jnp.pad(edge_feats.astype(jnp.float32), ((0, 0), (0, Fep - Fe)))

    # fc_full1 weight split by concat segment, zero-padded to lane width.
    w1s = jnp.pad(params['w1_src'], ((0, Fp - Fn), (0, Fp - Fn)))
    w1d = jnp.pad(params['w1_dst'], ((0, Fp - Fn), (0, Fp - Fn)))
    w1e = jnp.pad(params['w1_edge'], ((0, Fep - Fe), (0, Fp - Fn)))

    # Pack bias + 3x(gamma, beta) into one (8, Fp) array -> single DMA.
    small = jnp.zeros((8, Fp), jnp.float32)
    small = small.at[:7, :Fn].set(jnp.concatenate(
        [params['b1'],
         params['bn1_gamma'], params['bn1_beta'],
         params['bn2_gamma'], params['bn2_beta'],
         params['bn3_gamma'], params['bn3_beta']], axis=0))

    # One-hot gather matrices (dst_oh reused for the scatter-add in-kernel).
    src_oh = jax.nn.one_hot(src_idx, N, dtype=jnp.float32)   # [E, N]
    dst_oh = jax.nn.one_hot(dst_idx, N, dtype=jnp.float32)   # [E, N]

    vmem = pl.BlockSpec(memory_space=pltpu.MemorySpace.VMEM)
    out_p = pl.pallas_call(
        _cgcnn_kernel,
        out_shape=jax.ShapeDtypeStruct((N, Fp), jnp.float32),
        in_specs=[vmem] * 8,
        out_specs=vmem,
        compiler_params=pltpu.CompilerParams(vmem_limit_bytes=32 * 1024 * 1024),
    )(node_p, edge_p, src_oh, dst_oh, w1s, w1d, w1e, small)

    return out_p[:, :Fn], edge_feats


def init_params(key, node_in_fea, edge_in_fea):
    """Deterministic params mirroring nn.Linear / nn.BatchNorm1d defaults.

    fc_full2 is intentionally omitted: its output never reaches the module's
    output (bn2 is applied to nbr_filter in the reference), so it is dead code.
    """
    in_dim = 2 * node_in_fea + edge_in_fea
    k = float(in_dim) ** -0.5
    k0, k1 = jax.random.split(key, 2)
    w1 = jax.random.uniform(k0, (in_dim, node_in_fea), jnp.float32, -k, k)  # fc_full1.weight.T
    b1 = jax.random.uniform(k1, (1, node_in_fea), jnp.float32, -k, k)
    ones = jnp.ones((1, node_in_fea), jnp.float32)
    zeros = jnp.zeros((1, node_in_fea), jnp.float32)
    Fn = node_in_fea
    return dict(
        w1_src=w1[:Fn], w1_dst=w1[Fn:2 * Fn], w1_edge=w1[2 * Fn:], b1=b1,
        bn1_gamma=ones, bn1_beta=zeros,
        bn2_gamma=ones, bn2_beta=zeros,
        bn3_gamma=ones, bn3_beta=zeros,
    )


if __name__ == "__main__":
    key = jax.random.PRNGKey(0)
    N, E = 16, 32                 # nodes, edges
    node_in_fea, edge_in_fea = 32, 16

    k_node, k_edge, k_src, k_dst, k_p = jax.random.split(key, 5)
    node_feats = jax.random.normal(k_node, (N, node_in_fea), jnp.float32)
    edge_feats = jax.random.normal(k_edge, (E, edge_in_fea), jnp.float32)
    src_idx = jax.random.randint(k_src, (E,), 0, N)
    dst_idx = jax.random.randint(k_dst, (E,), 0, N)
    params = init_params(k_p, node_in_fea, edge_in_fea)

    new_node_feats, out_edge_feats = cgcnn_conv(
        node_feats, edge_feats, src_idx, dst_idx, params)
    jax.block_until_ready(new_node_feats)
    print("KERNEL_OK")
</pallas_src>

<mosaic_0001>
module attributes {stable_mosaic.version = 11 : i64} {
  func.func @_cgcnn_kernel(%arg0: memref<16x128xf32, #tpu.memory_space<vmem>>, %arg1: memref<32x128xf32, #tpu.memory_space<vmem>>, %arg2: memref<32x16xf32, #tpu.memory_space<vmem>>, %arg3: memref<32x16xf32, #tpu.memory_space<vmem>>, %arg4: memref<128x128xf32, #tpu.memory_space<vmem>>, %arg5: memref<128x128xf32, #tpu.memory_space<vmem>>, %arg6: memref<128x128xf32, #tpu.memory_space<vmem>>, %arg7: memref<8x128xf32, #tpu.memory_space<vmem>>, %arg8: memref<16x128xf32, #tpu.memory_space<vmem>>) attributes {dimension_semantics = [], scalar_prefetch = 0 : i64, scratch_operands = 0 : i64, tpu.core_type = #tpu.core_type<tc>} {
    %c0 = arith.constant 0 : index
    %c0_0 = arith.constant 0 : index
    %0 = vector.load %arg0[%c0, %c0_0] : memref<16x128xf32, #tpu.memory_space<vmem>>, vector<16x128xf32>
    %c0_1 = arith.constant 0 : index
    %c0_2 = arith.constant 0 : index
    %1 = vector.load %arg1[%c0_1, %c0_2] : memref<32x128xf32, #tpu.memory_space<vmem>>, vector<32x128xf32>
    %c0_3 = arith.constant 0 : index
    %c0_4 = arith.constant 0 : index
    %2 = vector.load %arg7[%c0_3, %c0_4] : memref<8x128xf32, #tpu.memory_space<vmem>>, vector<8x128xf32>
    %3 = vector.extract_strided_slice %2 {offsets = [0, 0], sizes = [1, 128], strides = [1, 1]} : vector<8x128xf32> to vector<1x128xf32>
    %4 = vector.extract_strided_slice %2 {offsets = [1, 0], sizes = [1, 128], strides = [1, 1]} : vector<8x128xf32> to vector<1x128xf32>
    %5 = vector.extract_strided_slice %2 {offsets = [2, 0], sizes = [1, 128], strides = [1, 1]} : vector<8x128xf32> to vector<1x128xf32>
    %6 = vector.extract_strided_slice %2 {offsets = [3, 0], sizes = [1, 128], strides = [1, 1]} : vector<8x128xf32> to vector<1x128xf32>
    %7 = vector.extract_strided_slice %2 {offsets = [4, 0], sizes = [1, 128], strides = [1, 1]} : vector<8x128xf32> to vector<1x128xf32>
    %8 = vector.extract_strided_slice %2 {offsets = [5, 0], sizes = [1, 128], strides = [1, 1]} : vector<8x128xf32> to vector<1x128xf32>
    %9 = vector.extract_strided_slice %2 {offsets = [6, 0], sizes = [1, 128], strides = [1, 1]} : vector<8x128xf32> to vector<1x128xf32>
    %c0_5 = arith.constant 0 : index
    %c0_6 = arith.constant 0 : index
    %10 = vector.load %arg4[%c0_5, %c0_6] : memref<128x128xf32, #tpu.memory_space<vmem>>, vector<128x128xf32>
    %cst = arith.constant dense<0.000000e+00> : vector<16x128xf32>
    %11 = tpu.matmul %0, %10, %cst {dimension_numbers = #tpu.dot_dimension_numbers<[1], [0], [0], [1], [0, 0, 1, 1], [], []>} : vector<16x128xf32>, vector<128x128xf32>, vector<16x128xf32> -> vector<16x128xf32>
    %c0_7 = arith.constant 0 : index
    %c0_8 = arith.constant 0 : index
    %12 = vector.load %arg5[%c0_7, %c0_8] : memref<128x128xf32, #tpu.memory_space<vmem>>, vector<128x128xf32>
    %cst_9 = arith.constant dense<0.000000e+00> : vector<16x128xf32>
    %13 = tpu.matmul %0, %12, %cst_9 {dimension_numbers = #tpu.dot_dimension_numbers<[1], [0], [0], [1], [0, 0, 1, 1], [], []>} : vector<16x128xf32>, vector<128x128xf32>, vector<16x128xf32> -> vector<16x128xf32>
    %c0_10 = arith.constant 0 : index
    %c0_11 = arith.constant 0 : index
    %14 = vector.load %arg6[%c0_10, %c0_11] : memref<128x128xf32, #tpu.memory_space<vmem>>, vector<128x128xf32>
    %cst_12 = arith.constant dense<0.000000e+00> : vector<32x128xf32>
    %15 = tpu.matmul %1, %14, %cst_12 {dimension_numbers = #tpu.dot_dimension_numbers<[1], [0], [0], [1], [0, 0, 1, 1], [], []>} : vector<32x128xf32>, vector<128x128xf32>, vector<32x128xf32> -> vector<32x128xf32>
    %c0_13 = arith.constant 0 : index
    %c0_14 = arith.constant 0 : index
    %16 = vector.load %arg2[%c0_13, %c0_14] : memref<32x16xf32, #tpu.memory_space<vmem>>, vector<32x16xf32>
    %cst_15 = arith.constant dense<0.000000e+00> : vector<32x128xf32>
    %17 = tpu.matmul %16, %11, %cst_15 {dimension_numbers = #tpu.dot_dimension_numbers<[1], [0], [0], [1], [0, 0, 1, 1], [], []>} : vector<32x16xf32>, vector<16x128xf32>, vector<32x128xf32> -> vector<32x128xf32>
    %c0_16 = arith.constant 0 : index
    %c0_17 = arith.constant 0 : index
    %18 = vector.load %arg3[%c0_16, %c0_17] : memref<32x16xf32, #tpu.memory_space<vmem>>, vector<32x16xf32>
    %cst_18 = arith.constant dense<0.000000e+00> : vector<32x128xf32>
    %19 = tpu.matmul %18, %13, %cst_18 {dimension_numbers = #tpu.dot_dimension_numbers<[1], [0], [0], [1], [0, 0, 1, 1], [], []>} : vector<32x16xf32>, vector<16x128xf32>, vector<32x128xf32> -> vector<32x128xf32>
    %20 = arith.addf %17, %19 : vector<32x128xf32>
    %21 = arith.addf %20, %15 : vector<32x128xf32>
    %22 = vector.broadcast %3 : vector<1x128xf32> to vector<32x128xf32>
    %23 = arith.addf %21, %22 : vector<32x128xf32>
    %cst_19 = arith.constant dense<0.000000e+00> : vector<128xf32>
    %24 = vector.multi_reduction <add>, %23, %cst_19 [0] : vector<32x128xf32> to vector<128xf32>
    %25 = vector.shape_cast %24 : vector<128xf32> to vector<1x128xf32>
    %26 = arith.mulf %23, %23 : vector<32x128xf32>
    %cst_20 = arith.constant dense<0.000000e+00> : vector<128xf32>
    %27 = vector.multi_reduction <add>, %26, %cst_20 [0] : vector<32x128xf32> to vector<128xf32>
    %28 = vector.shape_cast %27 : vector<128xf32> to vector<1x128xf32>
    %cst_21 = arith.constant 3.125000e-02 : f32
    %29 = vector.broadcast %cst_21 : f32 to vector<1x128xf32>
    %30 = arith.mulf %25, %29 : vector<1x128xf32>
    %cst_22 = arith.constant 3.125000e-02 : f32
    %31 = vector.broadcast %cst_22 : f32 to vector<1x128xf32>
    %32 = arith.mulf %28, %31 : vector<1x128xf32>
    %33 = arith.mulf %30, %30 : vector<1x128xf32>
    %34 = arith.subf %32, %33 : vector<1x128xf32>
    %cst_23 = arith.constant 0.000000e+00 : f32
    %35 = vector.broadcast %cst_23 : f32 to vector<1x128xf32>
    %36 = arith.maximumf %34, %35 : vector<1x128xf32>
    %37 = vector.broadcast %30 : vector<1x128xf32> to vector<32x128xf32>
    %38 = arith.subf %23, %37 : vector<32x128xf32>
    %39 = vector.broadcast %4 : vector<1x128xf32> to vector<32x128xf32>
    %40 = arith.mulf %39, %38 : vector<32x128xf32>
    %cst_24 = arith.constant 9.99999974E-6 : f32
    %41 = vector.broadcast %cst_24 : f32 to vector<1x128xf32>
    %42 = arith.addf %36, %41 : vector<1x128xf32>
    %43 = math.rsqrt %42 : vector<1x128xf32>
    %44 = vector.broadcast %43 : vector<1x128xf32> to vector<32x128xf32>
    %45 = arith.mulf %40, %44 : vector<32x128xf32>
    %46 = vector.broadcast %5 : vector<1x128xf32> to vector<32x128xf32>
    %47 = arith.addf %45, %46 : vector<32x128xf32>
    %48 = arith.negf %47 : vector<32x128xf32>
    %49 = math.exp %48 : vector<32x128xf32>
    %cst_25 = arith.constant 1.000000e+00 : f32
    %50 = vector.broadcast %cst_25 : f32 to vector<32x128xf32>
    %51 = arith.addf %50, %49 : vector<32x128xf32>
    %52 = arith.divf %50, %51 : vector<32x128xf32>
    %cst_26 = arith.constant dense<0.000000e+00> : vector<128xf32>
    %53 = vector.multi_reduction <add>, %52, %cst_26 [0] : vector<32x128xf32> to vector<128xf32>
    %54 = vector.shape_cast %53 : vector<128xf32> to vector<1x128xf32>
    %55 = arith.mulf %52, %52 : vector<32x128xf32>
    %cst_27 = arith.constant dense<0.000000e+00> : vector<128xf32>
    %56 = vector.multi_reduction <add>, %55, %cst_27 [0] : vector<32x128xf32> to vector<128xf32>
    %57 = vector.shape_cast %56 : vector<128xf32> to vector<1x128xf32>
    %cst_28 = arith.constant 3.125000e-02 : f32
    %58 = vector.broadcast %cst_28 : f32 to vector<1x128xf32>
    %59 = arith.mulf %54, %58 : vector<1x128xf32>
    %cst_29 = arith.constant 3.125000e-02 : f32
    %60 = vector.broadcast %cst_29 : f32 to vector<1x128xf32>
    %61 = arith.mulf %57, %60 : vector<1x128xf32>
    %62 = arith.mulf %59, %59 : vector<1x128xf32>
    %63 = arith.subf %61, %62 : vector<1x128xf32>
    %cst_30 = arith.constant 0.000000e+00 : f32
    %64 = vector.broadcast %cst_30 : f32 to vector<1x128xf32>
    %65 = arith.maximumf %63, %64 : vector<1x128xf32>
    %66 = vector.broadcast %59 : vector<1x128xf32> to vector<32x128xf32>
    %67 = arith.subf %52, %66 : vector<32x128xf32>
    %68 = vector.broadcast %6 : vector<1x128xf32> to vector<32x128xf32>
    %69 = arith.mulf %68, %67 : vector<32x128xf32>
    %cst_31 = arith.constant 9.99999974E-6 : f32
    %70 = vector.broadcast %cst_31 : f32 to vector<1x128xf32>
    %71 = arith.addf %65, %70 : vector<1x128xf32>
    %72 = math.rsqrt %71 : vector<1x128xf32>
    %73 = vector.broadcast %72 : vector<1x128xf32> to vector<32x128xf32>
    %74 = arith.mulf %69, %73 : vector<32x128xf32>
    %75 = vector.broadcast %7 : vector<1x128xf32> to vector<32x128xf32>
    %76 = arith.addf %74, %75 : vector<32x128xf32>
    %cst_32 = arith.constant 2.000000e+01 : f32
    %77 = vector.broadcast %cst_32 : f32 to vector<32x128xf32>
    %78 = arith.cmpf ogt, %76, %77 : vector<32x128xf32>
    %cst_33 = arith.constant 2.000000e+01 : f32
    %79 = vector.broadcast %cst_33 : f32 to vector<32x128xf32>
    %80 = arith.minimumf %76, %79 : vector<32x128xf32>
    %81 = math.exp %80 : vector<32x128xf32>
    %82 = math.log1p %81 : vector<32x128xf32>
    %83 = arith.select %78, %76, %82 : vector<32x128xi1>, vector<32x128xf32>
    %84 = arith.mulf %52, %83 : vector<32x128xf32>
    %c0_34 = arith.constant 0 : index
    %c0_35 = arith.constant 0 : index
    %85 = vector.load %arg3[%c0_34, %c0_35] : memref<32x16xf32, #tpu.memory_space<vmem>>, vector<32x16xf32>
    %cst_36 = arith.constant dense<0.000000e+00> : vector<16x128xf32>
    %86 = tpu.matmul %85, %84, %cst_36 {dimension_numbers = #tpu.dot_dimension_numbers<[0], [0], [1], [1], [0, 1, 1, 1], [], []>} : vector<32x16xf32>, vector<32x128xf32>, vector<16x128xf32> -> vector<16x128xf32>
    %cst_37 = arith.constant dense<0.000000e+00> : vector<128xf32>
    %87 = vector.multi_reduction <add>, %86, %cst_37 [0] : vector<16x128xf32> to vector<128xf32>
    %88 = vector.shape_cast %87 : vector<128xf32> to vector<1x128xf32>
    %89 = arith.mulf %86, %86 : vector<16x128xf32>
    %cst_38 = arith.constant dense<0.000000e+00> : vector<128xf32>
    %90 = vector.multi_reduction <add>, %89, %cst_38 [0] : vector<16x128xf32> to vector<128xf32>
    %91 = vector.shape_cast %90 : vector<128xf32> to vector<1x128xf32>
    %cst_39 = arith.constant 6.250000e-02 : f32
    %92 = vector.broadcast %cst_39 : f32 to vector<1x128xf32>
    %93 = arith.mulf %88, %92 : vector<1x128xf32>
    %cst_40 = arith.constant 6.250000e-02 : f32
    %94 = vector.broadcast %cst_40 : f32 to vector<1x128xf32>
    %95 = arith.mulf %91, %94 : vector<1x128xf32>
    %96 = arith.mulf %93, %93 : vector<1x128xf32>
    %97 = arith.subf %95, %96 : vector<1x128xf32>
    %cst_41 = arith.constant 0.000000e+00 : f32
    %98 = vector.broadcast %cst_41 : f32 to vector<1x128xf32>
    %99 = arith.maximumf %97, %98 : vector<1x128xf32>
    %100 = vector.broadcast %93 : vector<1x128xf32> to vector<16x128xf32>
    %101 = arith.subf %86, %100 : vector<16x128xf32>
    %102 = vector.broadcast %8 : vector<1x128xf32> to vector<16x128xf32>
    %103 = arith.mulf %102, %101 : vector<16x128xf32>
    %cst_42 = arith.constant 9.99999974E-6 : f32
    %104 = vector.broadcast %cst_42 : f32 to vector<1x128xf32>
    %105 = arith.addf %99, %104 : vector<1x128xf32>
    %106 = math.rsqrt %105 : vector<1x128xf32>
    %107 = vector.broadcast %106 : vector<1x128xf32> to vector<16x128xf32>
    %108 = arith.mulf %103, %107 : vector<16x128xf32>
    %109 = vector.broadcast %9 : vector<1x128xf32> to vector<16x128xf32>
    %110 = arith.addf %108, %109 : vector<16x128xf32>
    %111 = arith.addf %0, %110 : vector<16x128xf32>
    %c0_43 = arith.constant 0 : index
    %c0_44 = arith.constant 0 : index
    %112 = vector.load %arg8[%c0_43, %c0_44] : memref<16x128xf32, #tpu.memory_space<vmem>>, vector<16x128xf32>
    tpu.vector_store %arg8[%c0_43, %c0_44], %111 {strides = array<i32>} : memref<16x128xf32, #tpu.memory_space<vmem>>, vector<16x128xf32>,
    return
  }
}

</mosaic_0001>

<bundles_post_ra>
// kernel: tpu_custom_call.1
= control target key start
LH: loop header
LB: loop body
LE: loop exit
PB: predicated region body
PF: predicated region fallthrough
CT: control target
= control target key end

     0   :  { %13 = vsyncpa [#allocation3], 0  ;;  %s1670_s0 = inlined_call_operand.vmem [shape: f32[16,128], index: 0, kind: input, shape index: {}]   ;;  %s1671_s1 = inlined_call_operand.vmem [shape: f32[32,128], index: 1, kind: input, shape index: {}]   ;;  %s1672_s2 = inlined_call_operand.vmem [shape: f32[32,16], index: 2, kind: input, shape index: {}]   ;;  %s1673_s3 = inlined_call_operand.vmem [shape: f32[32,16], index: 3, kind: input, shape index: {}]   ;;  %s1674_s4 = inlined_call_operand.hbm [shape: f32[128,128], index: 4, kind: input, shape index: {}]   ;;  %s1675_s5 = inlined_call_operand.hbm [shape: f32[128,128], index: 5, kind: input, shape index: {}]   ;;  %s1676_s6 = inlined_call_operand.hbm [shape: f32[128,128], index: 6, kind: input, shape index: {}]   ;;  %s1677_s7 = inlined_call_operand.vmem [shape: f32[8,128], index: 7, kind: input, shape index: {}]   ;;  %s1678_s8 = inlined_call_operand.hbm [shape: f32[16,128], index: 8, kind: output, shape index: {}]  }
   0x1   :  { %14 = vsyncpa [#allocation6], 0 }
   0x2   :  { %15 = vsyncpa [#allocation4], 0  ;;  %s1427_s27 = smov [#allocation5]   ;;  %s1428_s29 = smov [#allocation2]  }
   0x3   :  { %s41_s28 = sshll.u32 %s1427_s27, 4  ;;  %s29_s30 = sshll.u32 %s1428_s29, 4  ;;  %s42_s28 = int_to_ptr.vmem [resolvable:$true] %s41_s28  ;;  %s1478_s30 = int_to_ptr.vmem [resolvable:$true] %s29_s30 }
   0x4   :  { %s1333_s11 = scalar_lea.hbm %s1675_s5, 2048 }
   0x5   :  { %p1334_p0 = scmp.ne.s32.totalorder %s1675_s5, %s1333_s11  ;;  %p1337_p1 = scmp.lt.u32.totalorder %s1333_s11, %s1675_s5 }
   0x7   :  { %p1339_p2 = pnand %p1337_p1, %p1334_p0 }
   0x9   :  { %1342 = shalt.err (!%p1339_p2)
}
   0xa   :  { %s1343_s16 = scalar_lea.vmem %s42_s28, 2048  ;;  %p1348_p4 = scmp.lt.s32.totalorder %s42_s28, %s42_s28 }
   0xb   :  { %p1344_p3 = scmp.ne.s32.totalorder %s42_s28, %s1343_s16  ;;  %p1349_p5 = scmp.lt.s32.totalorder %s1343_s16, %s1343_s16 }
   0xd   :  { %p1350_p6 = por %p1349_p5, %p1348_p4 }
   0xf   :  { %p1351_p7 = pnand %p1350_p6, %p1344_p3 }
  0x11   :  { %1354 = shalt.err (!%p1351_p7)
}
  0x12   :  { %s1429_s17 = smov 128   ;;  %s1430_s18 = smov 8  }
  0x13   :  { %47 = dma.hbm_to_vmem [thread:$0]  %s1675_s5, 2048, %s42_s28, [#allocation6], %s1429_s17, %s1429_s17, %s1430_s18  }
  0x14   :  { %s1355_s23 = scalar_lea.hbm %s1674_s4, 2048 }
  0x15   :  { %p1356_p8 = scmp.ne.s32.totalorder %s1674_s4, %s1355_s23  ;;  %p1359_p9 = scmp.lt.u32.totalorder %s1355_s23, %s1674_s4 }
  0x17   :  { %p1361_p10 = pnand %p1359_p9, %p1356_p8 }
  0x19   :  { %1364 = shalt.err (!%p1361_p10)
}
  0x1a   :  { %s1365_s29 = scalar_lea.vmem %s1478_s30, 2048  ;;  %p1370_p12 = scmp.lt.s32.totalorder %s1478_s30, %s1478_s30 }
  0x1b   :  { %p1366_p11 = scmp.ne.s32.totalorder %s1478_s30, %s1365_s29  ;;  %p1371_p13 = scmp.lt.s32.totalorder %s1365_s29, %s1365_s29 }
  0x1d   :  { %p1372_p0 = por %p1371_p13, %p1370_p12 }
  0x1f   :  { %p1373_p1 = pnand %p1372_p0, %p1366_p11 }
  0x21   :  { %1376 = shalt.err (!%p1373_p1)
}
  0x22   :  { %35 = dma.hbm_to_vmem [thread:$0]  %s1674_s4, 2048, %s1478_s30, [#allocation3], %s1429_s17, %s1429_s17, %s1430_s18  }
  0x23   :  { %s1431_s9 = smov [#allocation7]   ;;  %s1377_s13 = scalar_lea.hbm %s1676_s6, 2048 }
  0x24   :  { %s53_s10 = sshll.u32 %s1431_s9, 4  ;;  %p1378_p2 = scmp.ne.s32.totalorder %s1676_s6, %s1377_s13  ;;  %s54_s10 = int_to_ptr.vmem [resolvable:$true] %s53_s10 }
  0x25   :  { %p1381_p3 = scmp.lt.u32.totalorder %s1377_s13, %s1676_s6 }
  0x27   :  { %p1383_p4 = pnand %p1381_p3, %p1378_p2 }
  0x29   :  { %1386 = shalt.err (!%p1383_p4)
}
  0x2a   :  { %s1387_s20 = scalar_lea.vmem %s54_s10, 2048  ;;  %p1392_p6 = scmp.lt.s32.totalorder %s54_s10, %s54_s10 }
  0x2b   :  { %p1388_p5 = scmp.ne.s32.totalorder %s54_s10, %s1387_s20  ;;  %p1393_p7 = scmp.lt.s32.totalorder %s1387_s20, %s1387_s20 }
  0x2d   :  { %p1394_p8 = por %p1393_p7, %p1392_p6 }
  0x2f   :  { %p1395_p9 = pnand %p1394_p8, %p1388_p5 }
  0x31   :  { %1398 = shalt.err (!%p1395_p9)
}
  0x32   :  { %59 = dma.hbm_to_vmem [thread:$0]  %s1676_s6, 2048, %s54_s10, [#allocation6], %s1429_s17, %s1429_s17, %s1430_s18  }
  0x33   :  { %1421 = dma.done.wait [#allocation3], 2048  }
  0x34   :  { %1422 = vsyncadd [#allocation3], 4294965248 }
  0x35   :  { %1423 = dma.done.wait [#allocation6], 4096  }
  0x36   :  { %1424 = vsyncadd [#allocation6], 4294963200  ;;  %v78_v0 = vld [vmem:[#allocation2] sm:$0xff]  ;;  %v79_v1 = vld [vmem:[#allocation2 + $0x8] sm:$0xff]  ;;  %vm369_vm0 = vcmask 130048   ;;  %vm798_vm1 = vcmask 261120  }
  0x37   :  { %v80_v2 = vld [vmem:[#allocation2 + $0x10] sm:$0xff]  ;;  %v1168_v3 = vpack.c.bf16 %v79_v1, %v78_v0  ;;  %v81_v4 = vld [vmem:[#allocation2 + $0x18] sm:$0xff]  ;;  %v82_v6 = vld [vmem:[#allocation2 + $0x20] sm:$0xff] }
  0x38   :  { %v1172_v5 = vpack.c.bf16 %v81_v4, %v80_v2  ;;  %v83_v7 = vld [vmem:[#allocation2 + $0x28] sm:$0xff]  ;;  %v1533_v9 = vld [vmem:[%s1670_s0] sm:$0xff]  ;;  %v84_v10 = vld [vmem:[#allocation2 + $0x30] sm:$0xff] }
  0x39   :  { %1169 = vmatprep.subr.bf16.mxu1 %v1168_v3  ;;  %v1176_v8 = vpack.c.bf16 %v83_v7, %v82_v6  ;;  %v85_v11 = vld [vmem:[#allocation2 + $0x38] sm:$0xff]  ;;  %1061 = vmatprep.mubr.f32.mxu1 %v1533_v9  ;;  %v86_v13 = vld [vmem:[#allocation2 + $0x40] sm:$0xff]  ;;  %v87_v14 = vld [vmem:[#allocation2 + $0x48] sm:$0xff] }
  0x3a   :  { %1171 = vmatpush3.bf16.msra.mxu1 %v1168_v3  ;;  %v1180_v12 = vpack.c.bf16 %v85_v11, %v84_v10  ;;  %v1184_v15 = vpack.c.bf16 %v87_v14, %v86_v13  ;;  %v88_v16 = vld [vmem:[#allocation2 + $0x50] sm:$0xff]  ;;  %v89_v17 = vld [vmem:[#allocation2 + $0x58] sm:$0xff]  ;;  %v90_v19 = vld [vmem:[#allocation2 + $0x60] sm:$0xff] }
  0x3b   :  { %1173 = vmatprep.subr.bf16.mxu1 %v1172_v5  ;;  %v1188_v18 = vpack.c.bf16 %v89_v17, %v88_v16  ;;  %v91_v20 = vld [vmem:[#allocation2 + $0x68] sm:$0xff]  ;;  %v92_v22 = vld [vmem:[#allocation2 + $0x70] sm:$0xff]  ;;  %v93_v23 = vld [vmem:[#allocation2 + $0x78] sm:$0xff] }
  0x3c   :  { %v1192_v21 = vpack.c.bf16 %v91_v20, %v90_v19  ;;  %v1196_v24 = vpack.c.bf16 %v93_v23, %v92_v22  ;;  %v169_v25 = vld [vmem:[#allocation5] sm:$0xff]  ;;  %v170_v26 = vld [vmem:[#allocation5 + $0x8] sm:$0xff]  ;;  %v171_v28 = vld [vmem:[#allocation5 + $0x10] sm:$0xff] }
  0x3d   :  { %v1200_v27 = vpack.c.bf16 %v170_v26, %v169_v25  ;;  %v172_v29 = vld [vmem:[#allocation5 + $0x18] sm:$0xff]  ;;  %v1539_v30 = vld [vmem:[%s1670_s0 + $0x8] sm:$0xff]  ;;  %v173_v32 = vld [vmem:[#allocation5 + $0x20] sm:$0xff] }
  0x3e   :  { %1175 = vmatpush3.bf16.msra.mxu1 %v1172_v5  ;;  %v1204_v31 = vpack.c.bf16 %v172_v29, %v171_v28  ;;  %v174_v33 = vld [vmem:[#allocation5 + $0x28] sm:$0xff]  ;;  %v175_v35 = vld [vmem:[#allocation5 + $0x30] sm:$0xff]  ;;  %v176_v36 = vld [vmem:[#allocation5 + $0x38] sm:$0xff]  ;;  %v568_v29 = vlaneseq }
  0x3f   :  { %1177 = vmatprep.subr.bf16.mxu1 %v1176_v8  ;;  %v1208_v34 = vpack.c.bf16 %v174_v33, %v173_v32  ;;  %v1212_v37 = vpack.c.bf16 %v176_v36, %v175_v35  ;;  %v177_v38 = vld [vmem:[#allocation5 + $0x40] sm:$0xff]  ;;  %v178_v39 = vld [vmem:[#allocation5 + $0x48] sm:$0xff]  ;;  %v179_v41 = vld [vmem:[#allocation5 + $0x50] sm:$0xff] }
  0x40   :  { %v1216_v40 = vpack.c.bf16 %v178_v39, %v177_v38  ;;  %v180_v42 = vld [vmem:[#allocation5 + $0x58] sm:$0xff]  ;;  %v181_v44 = vld [vmem:[#allocation5 + $0x60] sm:$0xff]  ;;  %v182_v45 = vld [vmem:[#allocation5 + $0x68] sm:$0xff] }
  0x41   :  { %v1220_v43 = vpack.c.bf16 %v180_v42, %v179_v41  ;;  %v1224_v46 = vpack.c.bf16 %v182_v45, %v181_v44  ;;  %v183_v47 = vld [vmem:[#allocation5 + $0x70] sm:$0xff]  ;;  %v184_v48 = vld [vmem:[#allocation5 + $0x78] sm:$0xff]  ;;  %v260_v50 = vld [vmem:[#allocation7] sm:$0xff] }
  0x42   :  { %1179 = vmatpush3.bf16.msra.mxu1 %v1176_v8  ;;  %v1228_v49 = vpack.c.bf16 %v184_v48, %v183_v47  ;;  %v261_v51 = vld [vmem:[#allocation7 + $0x8] sm:$0xff]  ;;  %v262_v53 = vld [vmem:[#allocation7 + $0x10] sm:$0xff]  ;;  %v263_v54 = vld [vmem:[#allocation7 + $0x18] sm:$0xff] }
  0x43   :  { %1181 = vmatprep.subr.bf16.mxu1 %v1180_v12  ;;  %v1232_v52 = vpack.c.bf16 %v261_v51, %v260_v50  ;;  %v1236_v55 = vpack.c.bf16 %v263_v54, %v262_v53  ;;  %v264_v56 = vld [vmem:[#allocation7 + $0x20] sm:$0xff]  ;;  %v265_v57 = vld [vmem:[#allocation7 + $0x28] sm:$0xff]  ;;  %v266_v59 = vld [vmem:[#allocation7 + $0x30] sm:$0xff] }
  0x44   :  { %v1240_v58 = vpack.c.bf16 %v265_v57, %v264_v56  ;;  %v267_v60 = vld [vmem:[#allocation7 + $0x38] sm:$0xff]  ;;  %v73_v62 = vld [vmem:[%s1671_s1] sm:$0xff]  ;;  %v269_v0 = vld [vmem:[#allocation7 + $0x48] sm:$0xff] }
  0x45   :  { %1233 = vmatprep.subr.bf16.mxu0 %v1232_v52  ;;  %v1244_v61 = vpack.c.bf16 %v267_v60, %v266_v59  ;;  %v268_v63 = vld [vmem:[#allocation7 + $0x40] sm:$0xff]  ;;  %1131 = vmatprep.mubr.f32.mxu0 %v73_v62  ;;  %v270_v2 = vld [vmem:[#allocation7 + $0x50] sm:$0xff]  ;;  %v271_v3 = vld [vmem:[#allocation7 + $0x58] sm:$0xff] }
  0x46   :  { %1183 = vmatpush3.bf16.msra.mxu1 %v1180_v12  ;;  %1235 = vmatpush3.bf16.msra.mxu0 %v1232_v52  ;;  %v1248_v1 = vpack.c.bf16 %v269_v0, %v268_v63  ;;  %v1252_v4 = vpack.c.bf16 %v271_v3, %v270_v2  ;;  %v272_v5 = vld [vmem:[#allocation7 + $0x60] sm:$0xff]  ;;  %v273_v6 = vld [vmem:[#allocation7 + $0x68] sm:$0xff]  ;;  %v274_v8 = vld [vmem:[#allocation7 + $0x70] sm:$0xff] }
  0x47   :  { %1185 = vmatprep.subr.bf16.mxu1 %v1184_v15  ;;  %1237 = vmatprep.subr.bf16.mxu0 %v1236_v55  ;;  %v1256_v7 = vpack.c.bf16 %v273_v6, %v272_v5  ;;  %v275_v10 = vld [vmem:[#allocation7 + $0x78] sm:$0xff]  ;;  %v74_v12 = vld [vmem:[%s1671_s1 + $0x8] sm:$0xff]  ;;  %v75_v13 = vld [vmem:[%s1671_s1 + $0x10] sm:$0xff] }
  0x48   :  { %v1260_v11 = vpack.c.bf16 %v275_v10, %v274_v8  ;;  %v76_v14 = vld [vmem:[%s1671_s1 + $0x18] sm:$0xff]  ;;  %v366_v16 = vld [vmem:[%s1673_s3 + $0x8] sm:$0xff]  ;;  %v367_v17 = vld [vmem:[%s1673_s3 + $0x10] sm:$0xff] }
  0x49   :  { %v361_v25 = vld [vmem:[%s1672_s2] sm:$0xff]  ;;  %v362_v26 = vld [vmem:[%s1672_s2 + $0x8] sm:$0xff]  ;;  %v364_v28 = vld [vmem:[%s1672_s2 + $0x18] sm:$0xff] }
  0x4a   :  { %1187 = vmatpush3.bf16.msra.mxu1 %v1184_v15  ;;  %1239 = vmatpush3.bf16.msra.mxu0 %v1236_v55  ;;  %v365_v15 = vld [vmem:[%s1673_s3] sm:$0xff] }
  0x4b   :  { %1189 = vmatprep.subr.bf16.mxu1 %v1188_v18  ;;  %1241 = vmatprep.subr.bf16.mxu0 %v1240_v58  ;;  %v1594_v33 = vld [vmem:[%s1677_s7] sm:$0xff] }
  0x4c   :  { %766 = vxpose.xlu0.b32.start [1/4] (short) (narrow) %v365_v15, 16 }
  0x4e   :  { %1191 = vmatpush3.bf16.msra.mxu1 %v1188_v18  ;;  %1243 = vmatpush3.bf16.msra.mxu0 %v1240_v58  ;;  %v368_v18 = vld [vmem:[%s1673_s3 + $0x18] sm:$0xff] }
  0x4f   :  { %1193 = vmatprep.subr.bf16.mxu1 %v1192_v21  ;;  %1245 = vmatprep.subr.bf16.mxu0 %v1244_v61 }
  0x50   :  { %767 = vxpose.xlu0.b32.cont [2/4] (short) (narrow) %v366_v16, 16 }
  0x52   :  { %1195 = vmatpush3.bf16.msra.mxu1 %v1192_v21  ;;  %1247 = vmatpush3.bf16.msra.mxu0 %v1244_v61 }
  0x53   :  { %1197 = vmatprep.subr.bf16.mxu1 %v1196_v24  ;;  %1249 = vmatprep.subr.bf16.mxu0 %v1248_v1 }
  0x54   :  { %768 = vxpose.xlu0.b32.cont [3/4] (short) (narrow) %v367_v17, 16 }
  0x56   :  { %1199 = vmatpush3.bf16.msra.mxu1 %v1196_v24  ;;  %1251 = vmatpush3.bf16.msra.mxu0 %v1248_v1 }
  0x57   :  { %1201 = vmatprep.subr.bf16.mxu1 %v1200_v27  ;;  %1253 = vmatprep.subr.bf16.mxu0 %v1252_v4 }
  0x58   :  { %769 = vxpose.xlu0.b32.end [4/4] (short) (narrow) %v368_v18, 16 }
  0x59   :  { %1062 = vmatmul.mubr.f32.vlgmr.msra.gmra.mrb[0].mxu1 %v1539_v30 }
  0x5a   :  { %1203 = vmatpush3.bf16.msra.mxu1 %v1200_v27  ;;  %1096 = vmatprep.mubr.f32.mxu1 %v1533_v9  ;;  %v363_v27 = vld [vmem:[%s1672_s2 + $0x10] sm:$0xff]  ;;  %s1432_s2 = smov [#allocation8]  }
  0x5b   :  { %1205 = vmatprep.subr.bf16.mxu1 %v1204_v31  ;;  %1255 = vmatpush3.bf16.msra.mxu0 %v1252_v4  ;;  %s928_s7 = sshll.u32 %s1432_s2, 4  ;;  %s929_s7 = int_to_ptr.vmem [resolvable:$true] %s928_s7 }
  0x5c   :  { %1257 = vmatprep.subr.bf16.mxu0 %v1256_v7  ;;  %s1399_s0 = scalar_lea.vmem %s929_s7, 256  ;;  %p1404_p11 = scmp.lt.s32.totalorder %s929_s7, %s929_s7 }
  0x5d   :  { %p1400_p10 = scmp.ne.s32.totalorder %s929_s7, %s1399_s0  ;;  %p1405_p12 = scmp.lt.s32.totalorder %s1399_s0, %s1399_s0 }
  0x5e   :  { %1207 = vmatpush3.bf16.msra.mxu1 %v1204_v31  ;;  %v1588_v31 = vshrl.u32 %v568_v29, 7 }
  0x5f   :  { %1209 = vmatprep.subr.bf16.mxu1 %v1208_v34  ;;  %1259 = vmatpush3.bf16.msra.mxu0 %v1256_v7  ;;  %p1406_p13 = por %p1405_p12, %p1404_p11 }
  0x60   :  { %1261 = vmatprep.subr.bf16.mxu0 %v1260_v11  ;;  %v570_v32 = vsub.s32 0, %v1588_v31 }
  0x61   :  { %p1407_p0 = pnand %p1406_p13, %p1400_p10 }
  0x62   :  { %1211 = vmatpush3.bf16.msra.mxu1 %v1208_v34  ;;  %v571_v34 = vrot.slane %v1594_v33, %v570_v32 }
  0x63   :  { %1213 = vmatprep.subr.bf16.mxu1 %v1212_v37  ;;  %1263 = vmatpush3.bf16.msra.mxu0 %v1260_v11 }
  0x66   :  { %1215 = vmatpush3.bf16.msra.mxu1 %v1212_v37  ;;  %1132 = vmatmul.mubr.f32.vlgmr.msra.gmra.mrb[0].mxu0 %v74_v12 }
  0x67   :  { %1217 = vmatprep.subr.bf16.mxu1 %v1216_v40  ;;  %1134 = vmatprep.mubr.f32.mxu0 %v75_v13  ;;  %v609_v13 = vsub.s32 1, %v1588_v31 }
  0x6a   :  { %1219 = vmatpush3.bf16.msra.mxu1 %v1216_v40  ;;  %1135 = vmatmul.mubr.f32.gmra.mrb[2].mxu0 %v76_v14  ;;  %v623_v14 = vsub.s32 2, %v1588_v31 }
  0x6b   :  { %1221 = vmatprep.subr.bf16.mxu1 %v1220_v43  ;;  %1141 = vmatprep.mubr.msk.f32.mxu0 %vm369_vm0, %v365_v15  ;;  %v610_v15 = vrot.slane %v1594_v33, %v609_v13 }
  0x6e   :  { %1223 = vmatpush3.bf16.msra.mxu1 %v1220_v43 }
  0x6f   :  { %1225 = vmatprep.subr.bf16.mxu1 %v1224_v46 }
  0x72   :  { %1227 = vmatpush3.bf16.msra.mxu1 %v1224_v46 }
  0x73   :  { %1229 = vmatprep.subr.bf16.mxu1 %v1228_v49 }
  0x76   :  { %1231 = vmatpush3.bf16.msra.mxu1 %v1228_v49 }
  0x79   :  { %1097 = vmatmul.mubr.f32.vlgmr.msra.gmra.mrb[2].mxu1 %v1539_v30 }
  0xcc   :  { %v782_v11 = vpop.trf.xlu0 }
 0x12c   :  { %v1063_v19 = vpop.f32.mrb[0].mxu1 }
 0x12d   :  { %v160_v20 = vpop.f32.mrb[1].mxu1 }
 0x12e   :  { %v1268_v21 = vpack.c.bf16 %v1063_v19, %v160_v20 }
 0x14c   :  { %v1098_v22 = vpop.f32.mrb[2].mxu1 }
 0x14d   :  { %v251_v23 = vpop.f32.mrb[3].mxu1 }
 0x14e   :  { %v1264_v24 = vpack.c.bf16 %v1098_v22, %v251_v23 }
 0x150   :  { %1265 = vmatprep.subr.bf16.mxu0 %v1264_v24 }
 0x151   :  { %1267 = vmatpush3.bf16.msra.mxu0 %v1264_v24 }
 0x152   :  { %1269 = vmatprep.subr.bf16.mxu0 %v1268_v21 }
 0x154   :  { %1142 = vmatmul.mubr.msk.f32.vlgmr.msra.gmra.mrb[0].mxu0 %vm369_vm0, %v366_v16  ;;  %v624_v16 = vrot.slane %v1594_v33, %v623_v14  ;;  %v686_v14 = vsub.s32 3, %v1588_v31 }
 0x155   :  { %1271 = vmatpush3.bf16.msra.mxu0 %v1268_v21  ;;  %1144 = vmatprep.mubr.msk.f32.mxu0 %vm369_vm0, %v367_v17 }
 0x158   :  { %1145 = vmatmul.mubr.msk.f32.gmra.mrb[2].mxu0 %vm369_vm0, %v368_v18 }
 0x159   :  { %1151 = vmatprep.mubr.msk.f32.mxu0 %vm369_vm0, %v361_v25 }
 0x15c   :  { %1152 = vmatmul.mubr.msk.f32.vlgmr.msra.gmra.mrb[0].mxu0 %vm369_vm0, %v362_v26 }
 0x15d   :  { %1154 = vmatprep.mubr.msk.f32.mxu0 %vm369_vm0, %v363_v27 }
 0x160   :  { %1155 = vmatmul.mubr.msk.f32.gmra.mrb[2].mxu0 %vm369_vm0, %v364_v28 }
 0x161   :  { %1165 = vmatprep.mubr.msk.f32.mxu0 %vm798_vm1, %v782_v11 }
 0x22f   :  { %v1153_v35 = vpop.f32.mrb[0].mxu0 }
 0x230   :  { %v573_v36 = vadd.f32 %v1153_v35, %v571_v34  ;;  %v545_v37 = vpop.f32.mrb[1].mxu0 }
 0x231   :  { %v572_v38 = vadd.f32 %v571_v34, %v545_v37 }
 0x232   :  { %v586_v39 = vmul.f32 %v573_v36, %v573_v36 }
 0x233   :  { %v576_v40 = vadd.f32 %v573_v36, %v572_v38  ;;  %v585_v41 = vmul.f32 %v572_v38, %v572_v38  ;;  %v1156_v42 = vpop.f32.mrb[2].mxu0 }
 0x234   :  { %v555_v43 = vpop.f32.mrb[3].mxu0  ;;  %v575_v45 = vadd.f32 %v1156_v42, %v571_v34 }
 0x235   :  { %v589_v44 = vadd.f32 %v586_v39, %v585_v41  ;;  %v574_v46 = vadd.f32 %v571_v34, %v555_v43 }
 0x236   :  { %v588_v49 = vmul.f32 %v575_v45, %v575_v45 }
 0x237   :  { %v577_v47 = vadd.f32 %v576_v40, %v574_v46  ;;  %v587_v48 = vmul.f32 %v574_v46, %v574_v46 }
 0x239   :  { %v578_v50 = vadd.f32 %v577_v47, %v575_v45  ;;  %v590_v51 = vadd.f32 %v589_v44, %v587_v48 }
 0x23b   :  { %v579_v52 = vrot.slane %v578_v50, 4  ;;  %v591_v53 = vadd.f32 %v590_v51, %v588_v49 }
 0x23d   :  { %v580_v54 = vadd.f32 %v579_v52, %v578_v50  ;;  %v592_v55 = vrot.slane %v591_v53, 4 }
 0x23f   :  { %v581_v56 = vrot.slane %v580_v54, 2  ;;  %v593_v57 = vadd.f32 %v592_v55, %v591_v53 }
 0x241   :  { %v582_v58 = vadd.f32 %v581_v56, %v580_v54  ;;  %v594_v59 = vrot.slane %v593_v57, 2 }
 0x243   :  { %v583_v60 = vrot.slane %v582_v58, 1  ;;  %v595_v61 = vadd.f32 %v594_v59, %v593_v57 }
 0x245   :  { %v584_v62 = vadd.f32 %v583_v60, %v582_v58  ;;  %v596_v63 = vrot.slane %v595_v61, 1 }
 0x247   :  { %v597_v0 = vadd.f32 %v596_v63, %v595_v61  ;;  %v598_v1 = vmul.f32 0.03125, %v584_v62 }
 0x249   :  { %v599_v2 = vmul.f32 0.03125, %v597_v0  ;;  %v600_v3 = vmul.f32 %v598_v1, %v598_v1  ;;  %v603_v4 = vsub.f32 %v572_v38, %v598_v1  ;;  %v604_v5 = vsub.f32 %v573_v36, %v598_v1 }
 0x24a   :  { %v605_v6 = vsub.f32 %v574_v46, %v598_v1  ;;  %v606_v7 = vsub.f32 %v575_v45, %v598_v1 }
 0x24b   :  { %v601_v8 = vsub.f32 %v599_v2, %v600_v3  ;;  %v611_v17 = vmul.f32 %v610_v15, %v603_v4  ;;  %v612_v18 = vmul.f32 %v610_v15, %v604_v5 }
 0x24c   :  { %v613_v19 = vmul.f32 %v610_v15, %v605_v6  ;;  %v614_v20 = vmul.f32 %v610_v15, %v606_v7  ;;  %v687_v15 = vrot.slane %v1594_v33, %v686_v14 }
 0x24d   :  { %v602_v10 = vmax.f32 %v601_v8, 0.0 }
 0x24f   :  { %v615_v12 = vadd.f32 1e-05, %v602_v10 }
 0x251   :  { %1295 = vrsqrt.f32 %v615_v12 }
 0x25b   :  { %v1296_v21 = vpop.eup %1295 }
 0x25c   :  { %v617_v22 = vmul.f32 %v1296_v21, %v611_v17  ;;  %v618_v23 = vmul.f32 %v1296_v21, %v612_v18  ;;  %v619_v24 = vmul.f32 %v1296_v21, %v613_v19  ;;  %v620_v25 = vmul.f32 %v1296_v21, %v614_v20 }
 0x25e   :  { %v625_v26 = vadd.f32 %v624_v16, %v617_v22  ;;  %v626_v27 = vadd.f32 %v624_v16, %v618_v23  ;;  %v627_v28 = vadd.f32 %v624_v16, %v619_v24  ;;  %v628_v29 = vadd.f32 %v624_v16, %v620_v25 }
 0x25f   :  { %v700_v16 = vsub.s32 4, %v1588_v31 }
 0x260   :  { %v949_v32 = vmul.f32 -1.442695, %v625_v26  ;;  %v950_v34 = vmul.f32 -1.442695, %v626_v27  ;;  %v951_v35 = vmul.f32 -1.442695, %v627_v28 }
 0x261   :  { %v952_v36 = vmul.f32 -1.442695, %v628_v29  ;;  %v701_v21 = vrot.slane %v1594_v33, %v700_v16 }
 0x262   :  { %1297 = vpow2.f32 %v949_v32 }
 0x263   :  { %1299 = vpow2.f32 %v950_v34 }
 0x264   :  { %1301 = vpow2.f32 %v951_v35 }
 0x265   :  { %1303 = vpow2.f32 %v952_v36 }
 0x26c   :  { %v1298_v37 = vpop.eup %1297 }
 0x26d   :  { %v1300_v38 = vpop.eup %1299  ;;  %v641_v39 = vadd.f32 1.0, %v1298_v37 }
 0x26e   :  { %v1302_v40 = vpop.eup %1301  ;;  %v642_v41 = vadd.f32 1.0, %v1300_v38 }
 0x26f   :  { %v1304_v42 = vpop.eup %1303  ;;  %v643_v43 = vadd.f32 1.0, %v1302_v40  ;;  %1305 = vrcp.f32 %v641_v39 }
 0x270   :  { %v644_v44 = vadd.f32 1.0, %v1304_v42  ;;  %1307 = vrcp.f32 %v642_v41 }
 0x271   :  { %1309 = vrcp.f32 %v643_v43 }
 0x272   :  { %1311 = vrcp.f32 %v644_v44 }
 0x279   :  { %v1602_v45 = vpop.eup %1305 }
 0x27a   :  { %v1604_v46 = vpop.eup %1307  ;;  %v662_v47 = vmul.f32 %v1602_v45, %v1602_v45 }
 0x27b   :  { %v1608_v48 = vpop.eup %1309  ;;  %v653_v49 = vadd.f32 %v1604_v46, %v1602_v45  ;;  %v663_v50 = vmul.f32 %v1604_v46, %v1604_v46 }
 0x27c   :  { %v1614_v51 = vpop.eup %1311  ;;  %v664_v53 = vmul.f32 %v1608_v48, %v1608_v48 }
 0x27d   :  { %v654_v52 = vadd.f32 %v1608_v48, %v653_v49  ;;  %v666_v54 = vadd.f32 %v663_v50, %v662_v47  ;;  %v665_v56 = vmul.f32 %v1614_v51, %v1614_v51 }
 0x27f   :  { %v655_v55 = vadd.f32 %v1614_v51, %v654_v52  ;;  %v667_v57 = vadd.f32 %v666_v54, %v664_v53 }
 0x281   :  { %v656_v58 = vrot.slane %v655_v55, 4  ;;  %v668_v59 = vadd.f32 %v667_v57, %v665_v56 }
 0x283   :  { %v657_v60 = vadd.f32 %v656_v58, %v655_v55  ;;  %v669_v61 = vrot.slane %v668_v59, 4 }
 0x285   :  { %v658_v62 = vrot.slane %v657_v60, 2  ;;  %v670_v63 = vadd.f32 %v669_v61, %v668_v59 }
 0x287   :  { %v659_v0 = vadd.f32 %v658_v62, %v657_v60  ;;  %v671_v1 = vrot.slane %v670_v63, 2 }
 0x289   :  { %v660_v2 = vrot.slane %v659_v0, 1  ;;  %v672_v3 = vadd.f32 %v671_v1, %v670_v63 }
 0x28b   :  { %v661_v4 = vadd.f32 %v660_v2, %v659_v0  ;;  %v673_v5 = vrot.slane %v672_v3, 1 }
 0x28d   :  { %v674_v6 = vadd.f32 %v673_v5, %v672_v3  ;;  %v675_v7 = vmul.f32 0.03125, %v661_v4 }
 0x28f   :  { %v676_v8 = vmul.f32 0.03125, %v674_v6  ;;  %v677_v10 = vmul.f32 %v675_v7, %v675_v7  ;;  %v680_v17 = vsub.f32 %v1602_v45, %v675_v7  ;;  %v681_v18 = vsub.f32 %v1604_v46, %v675_v7 }
 0x290   :  { %v682_v19 = vsub.f32 %v1608_v48, %v675_v7  ;;  %v683_v20 = vsub.f32 %v1614_v51, %v675_v7 }
 0x291   :  { %v678_v11 = vsub.f32 %v676_v8, %v677_v10  ;;  %v688_v22 = vmul.f32 %v687_v15, %v680_v17  ;;  %v689_v23 = vmul.f32 %v687_v15, %v681_v18 }
 0x292   :  { %v690_v24 = vmul.f32 %v687_v15, %v682_v19  ;;  %v691_v25 = vmul.f32 %v687_v15, %v683_v20 }
 0x293   :  { %v679_v12 = vmax.f32 %v678_v11, 0.0 }
 0x295   :  { %v692_v13 = vadd.f32 1e-05, %v679_v12 }
 0x297   :  { %1313 = vrsqrt.f32 %v692_v13 }
 0x2a1   :  { %v1314_v26 = vpop.eup %1313 }
 0x2a2   :  { %v694_v27 = vmul.f32 %v1314_v26, %v688_v22  ;;  %v695_v28 = vmul.f32 %v1314_v26, %v689_v23  ;;  %v696_v29 = vmul.f32 %v1314_v26, %v690_v24  ;;  %v697_v32 = vmul.f32 %v1314_v26, %v691_v25 }
 0x2a4   :  { %v702_v34 = vadd.f32 %v701_v21, %v694_v27  ;;  %v703_v35 = vadd.f32 %v701_v21, %v695_v28  ;;  %v1630_v36 = vadd.f32 %v701_v21, %v696_v29  ;;  %v1632_v37 = vadd.f32 %v701_v21, %v697_v32 }
 0x2a6   :  { %v710_v38 = vmin.f32 %v702_v34, 20.0  ;;  %v711_v39 = vmin.f32 %v703_v35, 20.0  ;;  %v712_v40 = vmin.f32 %v1630_v36, 20.0  ;;  %v713_v41 = vmin.f32 %v1632_v37, 20.0 }
 0x2a7   :  { %vm706_vm2 = vcmp.gt.f32.partialorder %v702_v34, 20.0  ;;  %vm707_vm3 = vcmp.gt.f32.partialorder %v703_v35, 20.0  ;;  %vm708_vm4 = vcmp.gt.f32.partialorder %v1630_v36, 20.0  ;;  %vm709_vm9 = vcmp.gt.f32.partialorder %v1632_v37, 20.0 }
 0x2a8   :  { %v714_v42 = vmul.f32 1.442695, %v710_v38  ;;  %v716_v43 = vmul.f32 1.442695, %v711_v39  ;;  %v718_v44 = vmul.f32 1.442695, %v712_v40 }
 0x2a9   :  { %v720_v47 = vmul.f32 1.442695, %v713_v41 }
 0x2aa   :  { %1315 = vpow2.f32 %v714_v42 }
 0x2ab   :  { %1317 = vpow2.f32 %v716_v43 }
 0x2ac   :  { %1319 = vpow2.f32 %v718_v44 }
 0x2ad   :  { %1321 = vpow2.f32 %v720_v47 }
 0x2b4   :  { %v1316_v49 = vpop.eup %1315 }
 0x2b5   :  { %v1318_v50 = vpop.eup %1317  ;;  %v722_v52 = vadd.f32 1.0, %v1316_v49  ;;  %v725_v58 = vmul.f32 -0.5, %v1316_v49  ;;  %v728_v63 = vand.u32 2147483647, %v1316_v49 }
 0x2b6   :  { %v1320_v53 = vpop.eup %1319  ;;  %v731_v54 = vadd.f32 1.0, %v1318_v50  ;;  %v734_v59 = vmul.f32 -0.5, %v1318_v50  ;;  %v737_v1 = vand.u32 2147483647, %v1318_v50 }
 0x2b7   :  { %v1322_v55 = vpop.eup %1321  ;;  %1323 = vlog2.f32 %v722_v52  ;;  %v740_v56 = vadd.f32 1.0, %v1320_v53  ;;  %v743_v60 = vmul.f32 -0.5, %v1320_v53  ;;  %v726_v62 = vadd.f32 1.0, %v725_v58 }
 0x2b8   :  { %1325 = vlog2.f32 %v731_v54  ;;  %v749_v57 = vadd.f32 1.0, %v1322_v55  ;;  %v752_v61 = vmul.f32 -0.5, %v1322_v55  ;;  %v735_v0 = vadd.f32 1.0, %v734_v59 }
 0x2b9   :  { %1327 = vlog2.f32 %v740_v56  ;;  %v744_v2 = vadd.f32 1.0, %v743_v60  ;;  %v746_v4 = vand.u32 2147483647, %v1320_v53  ;;  %v727_v8 = vmul.f32 %v1316_v49, %v726_v62 }
 0x2ba   :  { %1329 = vlog2.f32 %v749_v57  ;;  %v753_v5 = vadd.f32 1.0, %v752_v61  ;;  %vm729_vm5 = vcmp.lt.f32.partialorder %v728_v63, 0.0004427343  ;;  %v736_v12 = vmul.f32 %v1318_v50, %v735_v0 }
 0x2bb   :  { %v755_v13 = vand.u32 2147483647, %v1322_v55  ;;  %vm738_vm6 = vcmp.lt.f32.partialorder %v737_v1, 0.0004427343  ;;  %v745_v16 = vmul.f32 %v1320_v53, %v744_v2  ;;  %vm747_vm7 = vcmp.lt.f32.partialorder %v746_v4, 0.0004427343 }
 0x2bc   :  { %v754_v20 = vmul.f32 %v1322_v55, %v753_v5  ;;  %v905_v63 = vsub.s32 5, %v1588_v31  ;;  %v915_v1 = vsub.s32 6, %v1588_v31 }
 0x2bd   :  { %vm756_vm8 = vcmp.lt.f32.partialorder %v755_v13, 0.0004427343 }
 0x2be   :  { %v906_v0 = vrot.slane %v1594_v33, %v905_v63  ;;  %v916_v4 = vrot.slane %v1594_v33, %v915_v1 }
 0x2c1   :  { %v1324_v3 = vpop.eup %1323 }
 0x2c2   :  { %v1326_v6 = vpop.eup %1325  ;;  %v724_v7 = vmul.f32 0.6931472, %v1324_v3 }
 0x2c3   :  { %v1328_v10 = vpop.eup %1327  ;;  %v733_v11 = vmul.f32 0.6931472, %v1326_v6 }
 0x2c4   :  { %v730_v14 = vsel %vm729_vm5, %v727_v8, %v724_v7  ;;  %v742_v15 = vmul.f32 0.6931472, %v1328_v10  ;;  %v1330_v17 = vpop.eup %1329 }
 0x2c5   :  { %v739_v18 = vsel %vm738_vm6, %v736_v12, %v733_v11  ;;  %v758_v19 = vsel %vm706_vm2, %v702_v34, %v730_v14  ;;  %v751_v24 = vmul.f32 0.6931472, %v1330_v17 }
 0x2c6   :  { %v759_v21 = vsel %vm707_vm3, %v703_v35, %v739_v18  ;;  %v762_v22 = vmul.f32 %v1602_v45, %v758_v19  ;;  %v748_v23 = vsel %vm747_vm7, %v745_v16, %v742_v15 }
 0x2c7   :  { %v763_v25 = vmul.f32 %v1604_v46, %v759_v21  ;;  %v760_v26 = vsel %vm708_vm4, %v1630_v36, %v748_v23  ;;  %v757_v27 = vsel %vm756_vm8, %v754_v20, %v751_v24  ;;  %v783_v46 = vpop.trf.xlu0 }
 0x2c8   :  { %v764_v28 = vmul.f32 %v1608_v48, %v760_v26  ;;  %v761_v32 = vsel %vm709_vm9, %v1632_v37, %v757_v27 }
 0x2c9   :  { %v1272_v29 = vpack.c.bf16 %v763_v25, %v762_v22  ;;  %v765_v34 = vmul.f32 %v1614_v51, %v761_v32 }
 0x2cb   :  { %1273 = vmatprep.subr.bf16.mxu0 %v1272_v29  ;;  %v1276_v45 = vpack.c.bf16 %v765_v34, %v764_v28 }
 0x2cc   :  { %1275 = vmatpush3.bf16.msra.mxu0 %v1272_v29 }
 0x2cd   :  { %1277 = vmatprep.subr.bf16.mxu0 %v1276_v45 }
 0x2d0   :  { %1279 = vmatpush3.bf16.msra.mxu0 %v1276_v45 }
 0x2d3   :  { %1166 = vmatmul.mubr.msk.f32.vlgmr.msra.gmra.mrb[4].mxu0 %vm798_vm1, %v783_v46 }
 0x3a6   :  { %v1167_v35 = vpop.f32.mrb[4].mxu0 }
 0x3a7   :  { %v888_v36 = vmul.f32 %v1167_v35, %v1167_v35  ;;  %v871_v38 = vpop.f32.mrb[5].mxu0 }
 0x3a8   :  { %v880_v39 = vadd.f32 %v1167_v35, %v871_v38  ;;  %v887_v40 = vmul.f32 %v871_v38, %v871_v38 }
 0x3aa   :  { %v881_v41 = vrot.slane %v880_v39, 4  ;;  %v889_v48 = vadd.f32 %v888_v36, %v887_v40 }
 0x3ac   :  { %v882_v42 = vadd.f32 %v881_v41, %v880_v39  ;;  %v890_v43 = vrot.slane %v889_v48, 4 }
 0x3ae   :  { %v883_v37 = vrot.slane %v882_v42, 2  ;;  %v891_v44 = vadd.f32 %v890_v43, %v889_v48 }
 0x3b0   :  { %v884_v51 = vadd.f32 %v883_v37, %v882_v42  ;;  %v892_v47 = vrot.slane %v891_v44, 2 }
 0x3b2   :  { %v885_v49 = vrot.slane %v884_v51, 1  ;;  %v893_v50 = vadd.f32 %v892_v47, %v891_v44 }
 0x3b4   :  { %v886_v52 = vadd.f32 %v885_v49, %v884_v51  ;;  %v894_v53 = vrot.slane %v893_v50, 1 }
 0x3b6   :  { %v895_v54 = vadd.f32 %v894_v53, %v893_v50  ;;  %v896_v55 = vmul.f32 0.0625, %v886_v52 }
 0x3b8   :  { %v897_v56 = vmul.f32 0.0625, %v895_v54  ;;  %v898_v57 = vmul.f32 %v896_v55, %v896_v55  ;;  %v901_v58 = vsub.f32 %v871_v38, %v896_v55  ;;  %v902_v59 = vsub.f32 %v1167_v35, %v896_v55 }
 0x3ba   :  { %v899_v60 = vsub.f32 %v897_v56, %v898_v57  ;;  %v907_v2 = vmul.f32 %v906_v0, %v901_v58  ;;  %v908_v3 = vmul.f32 %v906_v0, %v902_v59 }
 0x3bc   :  { %v900_v61 = vmax.f32 %v899_v60, 0.0 }
 0x3be   :  { %v909_v62 = vadd.f32 1e-05, %v900_v61 }
 0x3c0   :  { %1331 = vrsqrt.f32 %v909_v62 }
 0x3ca   :  { %v1332_v5 = vpop.eup %1331 }
 0x3cb   :  { %v911_v6 = vmul.f32 %v1332_v5, %v907_v2  ;;  %v912_v7 = vmul.f32 %v1332_v5, %v908_v3 }
 0x3cd   :  { %v917_v8 = vadd.f32 %v916_v4, %v911_v6  ;;  %v918_v10 = vadd.f32 %v916_v4, %v912_v7 }
 0x3cf   :  { %v919_v11 = vadd.f32 %v917_v8, %v1533_v9  ;;  %v920_v12 = vadd.f32 %v918_v10, %v1539_v30 }
 0x3d1   :  { %921 = vst [vmem:[#allocation8] sm:$0xff] %v919_v11  ;;  %922 = vst [vmem:[#allocation8 + $0x8] sm:$0xff] %v920_v12 }
 0x3d2   :  { %1410 = shalt.err (!%p1407_p0)
}
 0x3d3   :  { %s1411_s26 = scalar_lea.hbm %s1678_s8, 256 }
 0x3d4   :  { %p1412_p1 = scmp.ne.s32.totalorder %s1678_s8, %s1411_s26  ;;  %p1415_p2 = scmp.lt.u32.totalorder %s1411_s26, %s1678_s8 }
 0x3d6   :  { %p1417_p3 = pnand %p1415_p2, %p1412_p1 }
 0x3d8   :  { %1420 = shalt.err (!%p1417_p3)
}
 0x3d9   :  { %934 = dma.vmem_to_hbm [thread:$0]  %s929_s7, 256, %s1678_s8, [#allocation4], %s1429_s17, %s1429_s17, %s1430_s18  }
 0x3da   :  { %1425 = dma.done.wait [#allocation4], 256  }
 0x3db   :  { %1426 = vsyncadd [#allocation4], 4294967040 }
 0x3dc   :  { %938 = vsyncpa [#allocation3], 1 }
 0x3dd   :  { %939 = vsyncpa [#allocation6], 1 }
 0x3de   :  { %940 = vsyncpa [#allocation4], 1 }

</bundles_post_ra>
